<compile_context>
chip_gen: v7x
topology: tpu7x:2x2x1
jax: 0.10.0
libtpu: 0.0.40
codegen_flags: <defaults>
</compile_context>

<pallas_src>
import functools

import jax
import jax.numpy as jnp
from jax.experimental import pallas as pl
from jax.experimental.pallas import tpu as pltpu

_LANE = 128
_SUBLANE_BF16 = 16   # bf16 packs 2 rows per sublane -> use 16-row granularity


def _round_up(n: int, m: int) -> int:
    return ((n + m - 1) // m) * m


def _is_v5_tpu() -> bool:
    """v5e/v5p have no bf16 VALU -> keep elementwise (bias+ReLU) in f32 there."""
    try:
        return "v5" in jax.devices()[0].device_kind.lower()
    except Exception:
        return False


def _vmem_budget_bytes() -> int:
    """Generation-aware VMEM budget: ~80% of physical (51 MiB v7x, 102 MiB v5e/v6e)."""
    try:
        phys = int(pltpu.get_tpu_info().vmem_capacity_bytes)
    except Exception:
        phys = 64 * 1024 * 1024  # conservative: v7x per-TC VMEM
    return max(48 * 1024 * 1024, (phys * 4) // 5)


def _make_mlp_kernel(n_layers: int, act_dtype):
    """(Linear + ReLU) x (n_layers-1) + final Linear, on one batch tile."""

    def kernel(*refs):
        x_ref = refs[0]
        param_refs = refs[1: 1 + 2 * n_layers]
        out_ref = refs[1 + 2 * n_layers]

        h = x_ref[...]                                    # (TB, in_pad) bf16
        for i in range(n_layers):
            w = param_refs[2 * i][...]                    # (in_pad, out_pad)
            b = param_refs[2 * i + 1][...]                # (1, out_pad)
            # MXU matmul with f32 accumulation (bf16 inputs for hidden layers,
            # f32 for the tiny final head layer).
            acc = jnp.dot(h.astype(w.dtype), w,
                          preferred_element_type=jnp.float32)
            if i != n_layers - 1:
                # bias add + ReLU in act_dtype (bf16 on v6e/v7x, f32 on v5e)
                h = jnp.maximum(acc.astype(act_dtype) + b, 0.0)
            else:
                h = acc + b                               # f32 head output
        out_ref[...] = h                                  # lane-dense fused output

    return kernel


def prepare_linear_mdn_params(weights, biases, *, act_dtype=jnp.bfloat16):
    """One-time padding/casting of parameters (hoisted out of the forward path).

    Hidden-layer weights -> bf16, hidden biases -> act_dtype; the final (head)
    layer stays in f32 (tiny, feeds exp/softmax).  All feature dims are padded to
    multiples of 128 lanes with zeros, which keeps real outputs exact.
    """
    n_layers = len(weights)
    dims = [weights[0].shape[0]] + [w.shape[1] for w in weights]
    pdims = [_round_up(d, _LANE) for d in dims]

    params = []
    for li, (w, b) in enumerate(zip(weights, biases)):
        is_last = li == n_layers - 1
        w_dtype = jnp.float32 if is_last else jnp.bfloat16
        b_dtype = jnp.float32 if is_last else act_dtype
        w_p = jnp.zeros((pdims[li], pdims[li + 1]), w_dtype)
        w_p = w_p.at[: w.shape[0], : w.shape[1]].set(w.astype(w_dtype))
        b_p = jnp.zeros((1, pdims[li + 1]), b_dtype)
        b_p = b_p.at[0, : b.shape[0]].set(b.astype(b_dtype))
        params.append(w_p)
        params.append(b_p)
    return tuple(params)


def linear_mdn_forward(x, padded_params, *, output_dim: int, n_mixtures: int,
                       act_dtype=jnp.bfloat16, block_b=None,
                       single_buffer_weights: bool = True):
    """LinearMDN.forward via one Pallas kernel (MLP) + tiny MDN head in XLA.

    Args:
      x:             (B, input_dim) float32
      padded_params: output of prepare_linear_mdn_params (pre-padded, pre-cast)
    Returns:
      mu (B, K, O), sigma (B, K), pi (B, K)
    """
    B, in_dim = x.shape
    K, O = n_mixtures, output_dim
    head_dim = (O + 2) * K

    n_layers = len(padded_params) // 2
    p_w = padded_params[0::2]
    pdims = [p_w[0].shape[0]] + [w.shape[1] for w in p_w]
    out_pad = pdims[-1]
    assert out_pad >= head_dim

    SUB = _SUBLANE_BF16

    # ---- batch tile: >=2 grid tiles whenever B > 16 (v7x megacore), up to
    #      512-row tiles for large B; multiple of 16 rows for bf16 packing. ----
    if block_b is None:
        if B <= SUB:
            block_b = _round_up(max(B, 1), SUB)
        else:
            block_b = min(512, _round_up(-(-B // 2), SUB))
    block_b = _round_up(block_b, SUB)

    # ---- VMEM budget (generation-aware) and feasibility check. Weights/biases
    #      are single-buffered; x/out tiles are double-buffered. ----
    budget = _vmem_budget_bytes()
    wbuf = 1 if single_buffer_weights else 2
    param_bytes = wbuf * sum(int(p.size) * p.dtype.itemsize for p in padded_params)

    def _est(bb):
        x_bytes = 2 * bb * pdims[0] * 2            # double-buffered bf16 x tile
        out_bytes = 2 * bb * out_pad * 4           # double-buffered f32 out tile
        act_bytes = 3 * bb * max(pdims) * 4        # in-kernel activation slack
        return x_bytes + out_bytes + param_bytes + act_bytes + (2 << 20)

    est = _est(block_b)
    while est > budget and block_b > SUB:
        block_b = max(SUB, _round_up(block_b // 2, SUB))
        est = _est(block_b)
    if est > budget:
        # TODO(synk): for hidden layers too large to keep VMEM-resident, stream
        # weight tiles over a contraction/output-column grid axis instead of
        # failing; not needed at these model sizes.
        raise ValueError(
            f"LinearMDN weights ({param_bytes/2**20:.1f} MiB) do not fit the "
            f"VMEM budget ({budget/2**20:.1f} MiB) even at the smallest tile.")

    B_pad = _round_up(max(B, block_b), block_b)
    grid = (B_pad // block_b,)

    # x is padded AND pre-cast to bf16 here (halves the recurring input DMA).
    x_p = jnp.zeros((B_pad, pdims[0]), jnp.bfloat16).at[:B, :in_dim].set(
        x.astype(jnp.bfloat16))

    # x / output march over the batch grid axis; weights & biases are pinned to
    # block (0, 0) and (optionally) single-buffered.
    in_specs = [pl.BlockSpec((block_b, pdims[0]), lambda i: (i, 0))]
    for li in range(n_layers):
        w_shape = (pdims[li], pdims[li + 1])
        b_shape = (1, pdims[li + 1])
        if single_buffer_weights:
            in_specs.append(pl.BlockSpec(w_shape, lambda i: (0, 0),
                                         pipeline_mode=pl.Buffered(1)))
            in_specs.append(pl.BlockSpec(b_shape, lambda i: (0, 0),
                                         pipeline_mode=pl.Buffered(1)))
        else:
            in_specs.append(pl.BlockSpec(w_shape, lambda i: (0, 0)))
            in_specs.append(pl.BlockSpec(b_shape, lambda i: (0, 0)))

    out_specs = pl.BlockSpec((block_b, out_pad), lambda i: (i, 0))
    out_shape = jax.ShapeDtypeStruct((B_pad, out_pad), jnp.float32)

    vmem_limit = int(min(max(est, 32 * 1024 * 1024), budget))

    h_pad = pl.pallas_call(
        _make_mlp_kernel(n_layers, act_dtype),
        out_shape=out_shape,
        grid_spec=pltpu.PrefetchScalarGridSpec(
            num_scalar_prefetch=0,
            grid=grid,
            in_specs=in_specs,
            out_specs=out_specs,
        ),
        compiler_params=pltpu.CompilerParams(
            dimension_semantics=("parallel",),
            vmem_limit_bytes=vmem_limit,
        ),
    )(x_p, *padded_params)

    # ---- MDN head (K and O are a handful of columns) in plain JAX/XLA. ----
    h = h_pad[:B, :head_dim]
    mu = h[:, : K * O].reshape(B, K, O)
    sigma = jnp.exp(h[:, K * O: K * O + K])
    pi = jax.nn.softmax(h[:, K * (O + 1):], axis=-1)
    return mu, sigma, pi


def _reference_forward(x, weights, biases, output_dim, n_mixtures, act_dtype):
    """Pure-JAX reference matching the kernel's dtype strategy."""
    n = len(weights)
    h = x.astype(jnp.bfloat16)
    for i, (w, b) in enumerate(zip(weights, biases)):
        if i != n - 1:
            acc = jnp.dot(h.astype(jnp.bfloat16), w.astype(jnp.bfloat16),
                          preferred_element_type=jnp.float32)
            h = jnp.maximum(acc.astype(act_dtype) + b.astype(act_dtype), 0.0)
        else:
            acc = jnp.dot(h.astype(jnp.float32), w.astype(jnp.float32),
                          preferred_element_type=jnp.float32)
            h = acc + b.astype(jnp.float32)
    K, O = n_mixtures, output_dim
    mu = h[:, : K * O].reshape(-1, K, O)
    sigma = jnp.exp(h[:, K * O: K * O + K])
    pi = jax.nn.softmax(h[:, K * (O + 1):], axis=-1)
    return mu, sigma, pi


def init_linear_params(key, input_dim, hidden_dims, output_dim, n_mixtures):
    """Deterministic init mirroring nn.Linear default (uniform +/- 1/sqrt(fan_in))."""
    dims = [input_dim] + list(hidden_dims) + [(output_dim + 2) * n_mixtures]
    weights, biases = [], []
    for i in range(len(dims) - 1):
        fan_in, fan_out = dims[i], dims[i + 1]
        key, kw, kb = jax.random.split(key, 3)
        bound = 1.0 / jnp.sqrt(jnp.float32(fan_in))
        weights.append(
            jax.random.uniform(kw, (fan_in, fan_out), jnp.float32, -bound, bound))
        biases.append(
            jax.random.uniform(kb, (fan_out,), jnp.float32, -bound, bound))
    return weights, biases


if __name__ == "__main__":
    # Small shapes consistent with forward(x: (batch, input_dim)).
    batch = 64
    input_dim = 32
    hidden_dims = [64, 32]
    output_dim = 4
    n_mixtures = 5

    key = jax.random.PRNGKey(0)
    key, kx = jax.random.split(key)
    x = jax.random.normal(kx, (batch, input_dim), jnp.float32)

    weights, biases = init_linear_params(
        key, input_dim, hidden_dims, output_dim, n_mixtures)

    # bf16 elementwise on v6e/v7x, f32 on v5e (no bf16 VALU there).
    act_dtype = jnp.float32 if _is_v5_tpu() else jnp.bfloat16

    # One-time parameter padding / casting (out of the per-forward hot path).
    padded_params = prepare_linear_mdn_params(weights, biases, act_dtype=act_dtype)

    def make_fwd(single_buffer):
        return jax.jit(functools.partial(
            linear_mdn_forward, output_dim=output_dim, n_mixtures=n_mixtures,
            act_dtype=act_dtype, single_buffer_weights=single_buffer))

    # Auto tile selection gives block_b=32 -> a 2-tile batch grid at batch=64.
    try:
        fwd = make_fwd(True)
        mu, sigma, pi = fwd(x, padded_params)
        jax.block_until_ready((mu, sigma, pi))
    except Exception:
        # Fallback if this JAX version rejects pl.Buffered(1) single-buffering
        # of the resident weight/bias blocks.
        fwd = make_fwd(False)
        mu, sigma, pi = fwd(x, padded_params)
        jax.block_until_ready((mu, sigma, pi))

    assert mu.shape == (batch, n_mixtures, output_dim)
    assert sigma.shape == (batch, n_mixtures)
    assert pi.shape == (batch, n_mixtures)
    # pi rows sum to 1 (softmax done in f32 in the wrapper), sigma positive (exp).
    assert jnp.allclose(jnp.sum(pi, axis=-1), 1.0, atol=1e-4)
    assert bool(jnp.all(sigma > 0.0))

    # Cross-check against a pure-JAX reference with matching dtype strategy.
    mu_r, sigma_r, pi_r = _reference_forward(
        x, weights, biases, output_dim, n_mixtures, act_dtype)
    assert jnp.allclose(mu, mu_r, atol=2e-2, rtol=2e-2)
    assert jnp.allclose(sigma, sigma_r, atol=2e-2, rtol=2e-2)
    assert jnp.allclose(pi, pi_r, atol=2e-2, rtol=2e-2)

    print("KERNEL_OK")
</pallas_src>

<mosaic_0001>
module attributes {stable_mosaic.version = 11 : i64} {
  func.func @kernel(%arg0: i32, %arg1: memref<32x128xbf16, #tpu.memory_space<vmem>>, %arg2: memref<128x128xbf16, #tpu.memory_space<vmem>>, %arg3: memref<1x128xbf16, #tpu.memory_space<vmem>>, %arg4: memref<128x128xbf16, #tpu.memory_space<vmem>>, %arg5: memref<1x128xbf16, #tpu.memory_space<vmem>>, %arg6: memref<128x128xf32, #tpu.memory_space<vmem>>, %arg7: memref<1x128xf32, #tpu.memory_space<vmem>>, %arg8: memref<32x128xf32, #tpu.memory_space<vmem>>) attributes {dimension_semantics = [#tpu.dimension_semantics<parallel>], iteration_bounds = array<i64: 2>, scalar_prefetch = 0 : i64, scratch_operands = 0 : i64, tpu.core_type = #tpu.core_type<tc>, window_params = [{transform_indices = @transform_0, window_bounds = array<i64: 32, 128>}, {pipeline_mode = #tpu.pipeline_mode<synchronous>, transform_indices = @transform_1, window_bounds = array<i64: 128, 128>}, {pipeline_mode = #tpu.pipeline_mode<synchronous>, transform_indices = @transform_2, window_bounds = array<i64: 1, 128>}, {pipeline_mode = #tpu.pipeline_mode<synchronous>, transform_indices = @transform_3, window_bounds = array<i64: 128, 128>}, {pipeline_mode = #tpu.pipeline_mode<synchronous>, transform_indices = @transform_4, window_bounds = array<i64: 1, 128>}, {pipeline_mode = #tpu.pipeline_mode<synchronous>, transform_indices = @transform_5, window_bounds = array<i64: 128, 128>}, {pipeline_mode = #tpu.pipeline_mode<synchronous>, transform_indices = @transform_6, window_bounds = array<i64: 1, 128>}, {transform_indices = @transform_7, window_bounds = array<i64: 32, 128>}]} {
    %c0 = arith.constant 0 : index
    %c0_0 = arith.constant 0 : index
    %0 = vector.load %arg1[%c0, %c0_0] : memref<32x128xbf16, #tpu.memory_space<vmem>>, vector<32x128xbf16>
    %c0_1 = arith.constant 0 : index
    %c0_2 = arith.constant 0 : index
    %1 = vector.load %arg2[%c0_1, %c0_2] : memref<128x128xbf16, #tpu.memory_space<vmem>>, vector<128x128xbf16>
    %c0_3 = arith.constant 0 : index
    %c0_4 = arith.constant 0 : index
    %2 = vector.load %arg3[%c0_3, %c0_4] : memref<1x128xbf16, #tpu.memory_space<vmem>>, vector<1x128xbf16>
    %cst = arith.constant dense<0.000000e+00> : vector<32x128xf32>
    %3 = tpu.matmul %0, %1, %cst {dimension_numbers = #tpu.dot_dimension_numbers<[1], [0], [0], [1], [0, 0, 1, 1], [], []>} : vector<32x128xbf16>, vector<128x128xbf16>, vector<32x128xf32> -> vector<32x128xf32>
    %4 = arith.truncf %3 : vector<32x128xf32> to vector<32x128xbf16>
    %5 = vector.broadcast %2 : vector<1x128xbf16> to vector<32x128xbf16>
    %6 = arith.addf %4, %5 : vector<32x128xbf16>
    %cst_5 = arith.constant 0.000000e+00 : bf16
    %7 = vector.broadcast %cst_5 : bf16 to vector<32x128xbf16>
    %8 = arith.maximumf %6, %7 : vector<32x128xbf16>
    %c0_6 = arith.constant 0 : index
    %c0_7 = arith.constant 0 : index
    %9 = vector.load %arg4[%c0_6, %c0_7] : memref<128x128xbf16, #tpu.memory_space<vmem>>, vector<128x128xbf16>
    %c0_8 = arith.constant 0 : index
    %c0_9 = arith.constant 0 : index
    %10 = vector.load %arg5[%c0_8, %c0_9] : memref<1x128xbf16, #tpu.memory_space<vmem>>, vector<1x128xbf16>
    %cst_10 = arith.constant dense<0.000000e+00> : vector<32x128xf32>
    %11 = tpu.matmul %8, %9, %cst_10 {dimension_numbers = #tpu.dot_dimension_numbers<[1], [0], [0], [1], [0, 0, 1, 1], [], []>} : vector<32x128xbf16>, vector<128x128xbf16>, vector<32x128xf32> -> vector<32x128xf32>
    %12 = arith.truncf %11 : vector<32x128xf32> to vector<32x128xbf16>
    %13 = vector.broadcast %10 : vector<1x128xbf16> to vector<32x128xbf16>
    %14 = arith.addf %12, %13 : vector<32x128xbf16>
    %cst_11 = arith.constant 0.000000e+00 : bf16
    %15 = vector.broadcast %cst_11 : bf16 to vector<32x128xbf16>
    %16 = arith.maximumf %14, %15 : vector<32x128xbf16>
    %c0_12 = arith.constant 0 : index
    %c0_13 = arith.constant 0 : index
    %17 = vector.load %arg6[%c0_12, %c0_13] : memref<128x128xf32, #tpu.memory_space<vmem>>, vector<128x128xf32>
    %c0_14 = arith.constant 0 : index
    %c0_15 = arith.constant 0 : index
    %18 = vector.load %arg7[%c0_14, %c0_15] : memref<1x128xf32, #tpu.memory_space<vmem>>, vector<1x128xf32>
    %19 = arith.extf %16 : vector<32x128xbf16> to vector<32x128xf32>
    %cst_16 = arith.constant dense<0.000000e+00> : vector<32x128xf32>
    %20 = tpu.matmul %19, %17, %cst_16 {dimension_numbers = #tpu.dot_dimension_numbers<[1], [0], [0], [1], [0, 0, 1, 1], [], []>} : vector<32x128xf32>, vector<128x128xf32>, vector<32x128xf32> -> vector<32x128xf32>
    %21 = vector.broadcast %18 : vector<1x128xf32> to vector<32x128xf32>
    %22 = arith.addf %20, %21 : vector<32x128xf32>
    %c0_17 = arith.constant 0 : index
    %c0_18 = arith.constant 0 : index
    %23 = vector.load %arg8[%c0_17, %c0_18] : memref<32x128xf32, #tpu.memory_space<vmem>>, vector<32x128xf32>
    tpu.vector_store %arg8[%c0_17, %c0_18], %22 {strides = array<i32>} : memref<32x128xf32, #tpu.memory_space<vmem>>, vector<32x128xf32>,
    return
  }
  func.func @transform_0(%arg0: i32) -> (i32, i32) {
    %c0_i32 = arith.constant 0 : i32
    %c0_i32_0 = arith.constant 0 : i32
    return %arg0, %c0_i32 : i32, i32
  }
  func.func @transform_1(%arg0: i32) -> (i32, i32) {
    %c0_i32 = arith.constant 0 : i32
    %c0_i32_0 = arith.constant 0 : i32
    %c0_i32_1 = arith.constant 0 : i32
    return %c0_i32, %c0_i32_0 : i32, i32
  }
  func.func @transform_2(%arg0: i32) -> (i32, i32) {
    %c0_i32 = arith.constant 0 : i32
    %c0_i32_0 = arith.constant 0 : i32
    %c0_i32_1 = arith.constant 0 : i32
    return %c0_i32, %c0_i32_0 : i32, i32
  }
  func.func @transform_3(%arg0: i32) -> (i32, i32) {
    %c0_i32 = arith.constant 0 : i32
    %c0_i32_0 = arith.constant 0 : i32
    %c0_i32_1 = arith.constant 0 : i32
    return %c0_i32, %c0_i32_0 : i32, i32
  }
  func.func @transform_4(%arg0: i32) -> (i32, i32) {
    %c0_i32 = arith.constant 0 : i32
    %c0_i32_0 = arith.constant 0 : i32
    %c0_i32_1 = arith.constant 0 : i32
    return %c0_i32, %c0_i32_0 : i32, i32
  }
  func.func @transform_5(%arg0: i32) -> (i32, i32) {
    %c0_i32 = arith.constant 0 : i32
    %c0_i32_0 = arith.constant 0 : i32
    %c0_i32_1 = arith.constant 0 : i32
    return %c0_i32, %c0_i32_0 : i32, i32
  }
  func.func @transform_6(%arg0: i32) -> (i32, i32) {
    %c0_i32 = arith.constant 0 : i32
    %c0_i32_0 = arith.constant 0 : i32
    %c0_i32_1 = arith.constant 0 : i32
    return %c0_i32, %c0_i32_0 : i32, i32
  }
  func.func @transform_7(%arg0: i32) -> (i32, i32) {
    %c0_i32 = arith.constant 0 : i32
    %c0_i32_0 = arith.constant 0 : i32
    return %arg0, %c0_i32 : i32, i32
  }
}

module attributes {stable_mosaic.version = 11 : i64} {
  func.func @kernel(%arg0: i32, %arg1: memref<32x128xbf16, #tpu.memory_space<vmem>>, %arg2: memref<128x128xbf16, #tpu.memory_space<vmem>>, %arg3: memref<1x128xbf16, #tpu.memory_space<vmem>>, %arg4: memref<128x128xbf16, #tpu.memory_space<vmem>>, %arg5: memref<1x128xbf16, #tpu.memory_space<vmem>>, %arg6: memref<128x128xf32, #tpu.memory_space<vmem>>, %arg7: memref<1x128xf32, #tpu.memory_space<vmem>>, %arg8: memref<32x128xf32, #tpu.memory_space<vmem>>) attributes {dimension_semantics = [#tpu.dimension_semantics<parallel>], iteration_bounds = array<i64: 2>, scalar_prefetch = 0 : i64, scratch_operands = 0 : i64, tpu.core_type = #tpu.core_type<tc>, window_params = [{transform_indices = @transform_0, window_bounds = array<i64: 32, 128>}, {pipeline_mode = #tpu.pipeline_mode<synchronous>, transform_indices = @transform_1, window_bounds = array<i64: 128, 128>}, {pipeline_mode = #tpu.pipeline_mode<synchronous>, transform_indices = @transform_2, window_bounds = array<i64: 1, 128>}, {pipeline_mode = #tpu.pipeline_mode<synchronous>, transform_indices = @transform_3, window_bounds = array<i64: 128, 128>}, {pipeline_mode = #tpu.pipeline_mode<synchronous>, transform_indices = @transform_4, window_bounds = array<i64: 1, 128>}, {pipeline_mode = #tpu.pipeline_mode<synchronous>, transform_indices = @transform_5, window_bounds = array<i64: 128, 128>}, {pipeline_mode = #tpu.pipeline_mode<synchronous>, transform_indices = @transform_6, window_bounds = array<i64: 1, 128>}, {transform_indices = @transform_7, window_bounds = array<i64: 32, 128>}]} {
    %c0 = arith.constant 0 : index
    %c0_0 = arith.constant 0 : index
    %0 = vector.load %arg1[%c0, %c0_0] : memref<32x128xbf16, #tpu.memory_space<vmem>>, vector<32x128xbf16>
    %c0_1 = arith.constant 0 : index
    %c0_2 = arith.constant 0 : index
    %1 = vector.load %arg2[%c0_1, %c0_2] : memref<128x128xbf16, #tpu.memory_space<vmem>>, vector<128x128xbf16>
    %c0_3 = arith.constant 0 : index
    %c0_4 = arith.constant 0 : index
    %2 = vector.load %arg3[%c0_3, %c0_4] : memref<1x128xbf16, #tpu.memory_space<vmem>>, vector<1x128xbf16>
    %cst = arith.constant dense<0.000000e+00> : vector<32x128xf32>
    %3 = tpu.matmul %0, %1, %cst {dimension_numbers = #tpu.dot_dimension_numbers<[1], [0], [0], [1], [0, 0, 1, 1], [], []>} : vector<32x128xbf16>, vector<128x128xbf16>, vector<32x128xf32> -> vector<32x128xf32>
    %4 = arith.truncf %3 : vector<32x128xf32> to vector<32x128xbf16>
    %5 = vector.broadcast %2 : vector<1x128xbf16> to vector<32x128xbf16>
    %6 = arith.addf %4, %5 : vector<32x128xbf16>
    %cst_5 = arith.constant 0.000000e+00 : bf16
    %7 = vector.broadcast %cst_5 : bf16 to vector<32x128xbf16>
    %8 = arith.maximumf %6, %7 : vector<32x128xbf16>
    %c0_6 = arith.constant 0 : index
    %c0_7 = arith.constant 0 : index
    %9 = vector.load %arg4[%c0_6, %c0_7] : memref<128x128xbf16, #tpu.memory_space<vmem>>, vector<128x128xbf16>
    %c0_8 = arith.constant 0 : index
    %c0_9 = arith.constant 0 : index
    %10 = vector.load %arg5[%c0_8, %c0_9] : memref<1x128xbf16, #tpu.memory_space<vmem>>, vector<1x128xbf16>
    %cst_10 = arith.constant dense<0.000000e+00> : vector<32x128xf32>
    %11 = tpu.matmul %8, %9, %cst_10 {dimension_numbers = #tpu.dot_dimension_numbers<[1], [0], [0], [1], [0, 0, 1, 1], [], []>} : vector<32x128xbf16>, vector<128x128xbf16>, vector<32x128xf32> -> vector<32x128xf32>
    %12 = arith.truncf %11 : vector<32x128xf32> to vector<32x128xbf16>
    %13 = vector.broadcast %10 : vector<1x128xbf16> to vector<32x128xbf16>
    %14 = arith.addf %12, %13 : vector<32x128xbf16>
    %cst_11 = arith.constant 0.000000e+00 : bf16
    %15 = vector.broadcast %cst_11 : bf16 to vector<32x128xbf16>
    %16 = arith.maximumf %14, %15 : vector<32x128xbf16>
    %c0_12 = arith.constant 0 : index
    %c0_13 = arith.constant 0 : index
    %17 = vector.load %arg6[%c0_12, %c0_13] : memref<128x128xf32, #tpu.memory_space<vmem>>, vector<128x128xf32>
    %c0_14 = arith.constant 0 : index
    %c0_15 = arith.constant 0 : index
    %18 = vector.load %arg7[%c0_14, %c0_15] : memref<1x128xf32, #tpu.memory_space<vmem>>, vector<1x128xf32>
    %19 = arith.extf %16 : vector<32x128xbf16> to vector<32x128xf32>
    %cst_16 = arith.constant dense<0.000000e+00> : vector<32x128xf32>
    %20 = tpu.matmul %19, %17, %cst_16 {dimension_numbers = #tpu.dot_dimension_numbers<[1], [0], [0], [1], [0, 0, 1, 1], [], []>} : vector<32x128xf32>, vector<128x128xf32>, vector<32x128xf32> -> vector<32x128xf32>
    %21 = vector.broadcast %18 : vector<1x128xf32> to vector<32x128xf32>
    %22 = arith.addf %20, %21 : vector<32x128xf32>
    %c0_17 = arith.constant 0 : index
    %c0_18 = arith.constant 0 : index
    %23 = vector.load %arg8[%c0_17, %c0_18] : memref<32x128xf32, #tpu.memory_space<vmem>>, vector<32x128xf32>
    tpu.vector_store %arg8[%c0_17, %c0_18], %22 {strides = array<i32>} : memref<32x128xf32, #tpu.memory_space<vmem>>, vector<32x128xf32>,
    return
  }
  func.func @transform_0(%arg0: i32) -> (i32, i32) {
    %c0_i32 = arith.constant 0 : i32
    %c0_i32_0 = arith.constant 0 : i32
    return %arg0, %c0_i32 : i32, i32
  }
  func.func @transform_1(%arg0: i32) -> (i32, i32) {
    %c0_i32 = arith.constant 0 : i32
    %c0_i32_0 = arith.constant 0 : i32
    %c0_i32_1 = arith.constant 0 : i32
    return %c0_i32, %c0_i32_0 : i32, i32
  }
  func.func @transform_2(%arg0: i32) -> (i32, i32) {
    %c0_i32 = arith.constant 0 : i32
    %c0_i32_0 = arith.constant 0 : i32
    %c0_i32_1 = arith.constant 0 : i32
    return %c0_i32, %c0_i32_0 : i32, i32
  }
  func.func @transform_3(%arg0: i32) -> (i32, i32) {
    %c0_i32 = arith.constant 0 : i32
    %c0_i32_0 = arith.constant 0 : i32
    %c0_i32_1 = arith.constant 0 : i32
    return %c0_i32, %c0_i32_0 : i32, i32
  }
  func.func @transform_4(%arg0: i32) -> (i32, i32) {
    %c0_i32 = arith.constant 0 : i32
    %c0_i32_0 = arith.constant 0 : i32
    %c0_i32_1 = arith.constant 0 : i32
    return %c0_i32, %c0_i32_0 : i32, i32
  }
  func.func @transform_5(%arg0: i32) -> (i32, i32) {
    %c0_i32 = arith.constant 0 : i32
    %c0_i32_0 = arith.constant 0 : i32
    %c0_i32_1 = arith.constant 0 : i32
    return %c0_i32, %c0_i32_0 : i32, i32
  }
  func.func @transform_6(%arg0: i32) -> (i32, i32) {
    %c0_i32 = arith.constant 0 : i32
    %c0_i32_0 = arith.constant 0 : i32
    %c0_i32_1 = arith.constant 0 : i32
    return %c0_i32, %c0_i32_0 : i32, i32
  }
  func.func @transform_7(%arg0: i32) -> (i32, i32) {
    %c0_i32 = arith.constant 0 : i32
    %c0_i32_0 = arith.constant 0 : i32
    return %arg0, %c0_i32 : i32, i32
  }
}

</mosaic_0001>

<bundles_post_ra>
// kernel: linear_mdn_forward.1
= control target key start
LH: loop header
LB: loop body
LE: loop exit
PB: predicated region body
PF: predicated region fallthrough
CT: control target
= control target key end

     0   :  { %12 = vsyncpa [#allocation3], 0  ;;  %s1074_s24 = smov 0   ;;  %s1222_s0 = inlined_call_operand.vmem [shape: bf16[64,128], index: 0, kind: input, shape index: {}]   ;;  %s1223_s1 = inlined_call_operand.vmem [shape: bf16[128,128], index: 1, kind: input, shape index: {}]   ;;  %s1224_s2 = inlined_call_operand.vmem [shape: bf16[1,128], index: 2, kind: input, shape index: {}]   ;;  %s1225_s3 = inlined_call_operand.hbm [shape: bf16[128,128], index: 3, kind: input, shape index: {}]   ;;  %s1226_s4 = inlined_call_operand.vmem [shape: bf16[1,128], index: 4, kind: input, shape index: {}]   ;;  %s1227_s5 = inlined_call_operand.vmem [shape: f32[128,128], index: 5, kind: input, shape index: {}]   ;;  %s1228_s6 = inlined_call_operand.vmem [shape: f32[1,128], index: 6, kind: input, shape index: {}]   ;;  %s1229_s7 = inlined_call_operand.vmem [shape: f32[64,128], index: 7, kind: output, shape index: {}]  }
   0x1 LB: > { %s752_s25 = sadd.s32 4294967295, %s1028_s24   ;;  %p754_p0 = scmp.ge.s32.totalorder %s1028_s24, 1  ;;  %s1028_s24 = sphi %s1074_s24, %s18_s24  }
   0x2   : > { %p201_p1 = scmp.lt.s32.totalorder %s1028_s24, 3  ;;  %s1030_s26 = smov [#allocation2]  }
   0x3   : > { %s219_s27 = sshll.u32 %s1030_s26, 4  ;;  %p1088_p3 = scmp.eq.s32.totalorder %s752_s25, 0  ;;  %s220_s27 = int_to_ptr.vmem [resolvable:$true] %s219_s27 }
   0x4   : > { %p1082_p2 = pnand %p754_p0, %p201_p1  ;;  %s990_s10 = scalar_lea.hbm %s1225_s3, 1024 }
   0x5   : > { %s1234_s29 = scalar_select %p1088_p3, 1, 0 }
   0x6   : > { %s1233_s28 = scalar_select %p1082_p2, 1, 0 }
   0x7   : > { %p954_p4 = pneg %p1082_p2  ;;  %p991_p6 = scmp.ne.s32.totalorder %s1225_s3, %s990_s10 }
   0x8   : > { %p997_p10 = scmp.lt.u32.totalorder %s990_s10, %s1225_s3 }
   0x9   : > { %p1096_p5 = pnand %p1088_p3, %p954_p4 }
   0xb   : > { %p992_p7 = pneg %p1096_p5 }
   0xd   : > { %p993_p8 = pnand %p992_p7, %p991_p6 }
   0xf   : > { %p994_p9 = pneg %p993_p8 }
  0x11   : > { %p999_p11 = pnand %p997_p10, %p994_p9 }
  0x13   : > { %1002 = shalt.err (!%p999_p11)
}
  0x14   : > { %s1003_s15 = scalar_lea.vmem %s220_s27, 1024  ;;  %p1011_p1 = scmp.lt.s32.totalorder %s220_s27, %s220_s27 }
  0x15   : > { %p1004_p12 = scmp.ne.s32.totalorder %s220_s27, %s1003_s15  ;;  %p1012_p4 = scmp.lt.s32.totalorder %s1003_s15, %s1003_s15 }
  0x17   : > { %p1006_p13 = pnand %p1004_p12, %p992_p7  ;;  %p1013_p3 = por %p1012_p4, %p1011_p1 }
  0x19   : > { %p1007_p0 = pneg %p1006_p13 }
  0x1b   : > { %p1014_p2 = pnand %p1013_p3, %p1007_p0 }
  0x1d   : > { %1017 = shalt.err (!%p1014_p2)
}
  0x1e   : > { %s1031_s16 = smov 64   ;;  %s1032_s17 = smov 4  }
  0x1f   : > { %957 = dma.hbm_to_vmem [thread:$0]  (!%p1096_p5), %s1225_s3, 1024, %s220_s27, [#allocation3], %s1031_s16, %s1031_s16, %s1032_s17  }
  0x20   : > { %p1236_p6 = scmp.ne.s32.totalorder %s1233_s28, 0 }
  0x21   : > { %p1237_p8 = scmp.ne.s32.totalorder (!%p1236_p6), %s1234_s29, 0 }
  0x22   : > { %253 = sbr.rel (%p1236_p6) target bundleno = 737 (0x2e1), region = 48 }
  0x29   : > { %1023 = dma.done.wait (%p1237_p8), [#allocation3], 1024  }
  0x2a   : > { %1025 = vsyncadd (%p1237_p8), [#allocation3], 4294966272  ;;  %s759_s20 = sshll.u32 %s752_s25, 2  ;;  %v972_v0 = vld [vmem:[%s1223_s1] sm:$0xff]   ;;  %v973_v1 = vld [vmem:[%s1223_s1 + $0x8] sm:$0xff]   ;;  %v433_v33 = vlaneseq  ;;  %v1033_v47 = vmov 0  }
  0x2b   : > { %p286_p2 = scmp.lt.s32.totalorder %s759_s20, 7  ;;  %824 = vmatprep.subr.bf16.mxu0 %v972_v0  ;;  %v974_v2 = vld [vmem:[%s1223_s1 + $0x10] sm:$0xff]   ;;  %v975_v3 = vld [vmem:[%s1223_s1 + $0x18] sm:$0xff]   ;;  %v982_v5 = vld [vmem:[#allocation2] sm:$0xff]  }
  0x2c   : > { %825 = vmatpush3.bf16.msra.mxu0 %v972_v0  ;;  %v983_v6 = vld [vmem:[#allocation2 + $0x8] sm:$0xff]   ;;  %v976_v7 = vld [vmem:[%s1223_s1 + $0x20] sm:$0xff]   ;;  %844 = vmatprep.subr.bf16.mxu1 %v982_v5  ;;  %v984_v8 = vld [vmem:[#allocation2 + $0x10] sm:$0xff]   ;;  %v434_v34 = vshrl.u32 %v433_v33, 7 }
  0x2d   : > { %s1239_s20 = smov (!%p286_p2, %s759_s20), 7  ;;  %826 = vmatprep.subr.bf16.mxu0 %v973_v1  ;;  %845 = vmatpush3.bf16.msra.mxu1 %v982_v5  ;;  %v977_v9 = vld [vmem:[%s1223_s1 + $0x28] sm:$0xff]   ;;  %v985_v10 = vld [vmem:[#allocation2 + $0x18] sm:$0xff]   ;;  %v978_v11 = vld [vmem:[%s1223_s1 + $0x30] sm:$0xff]  }
  0x2e   : > { %s760_s27 = sshll.u32 %s1239_s20, 2  ;;  %846 = vmatprep.subr.bf16.mxu1 %v983_v6  ;;  %v986_v12 = vld [vmem:[#allocation2 + $0x20] sm:$0xff]   ;;  %v979_v13 = vld [vmem:[%s1223_s1 + $0x38] sm:$0xff]   ;;  %v987_v14 = vld [vmem:[#allocation2 + $0x28] sm:$0xff]   ;;  %v435_v37 = vsub.s32 0, %v434_v34  ;;  %s762_s13 = sshll.u32 %s1239_s20, 3 }
  0x2f   : > { %s1139_s8 = scalar_lea.vmem %s1222_s0, %s760_s27  ;;  %v988_v16 = vld [vmem:[#allocation2 + $0x30] sm:$0xff]   ;;  %v989_v17 = vld [vmem:[#allocation2 + $0x38] sm:$0xff]   ;;  %v568_v18 = vld [vmem:[%s1227_s5] sm:$0xff]  ;;  %s295_s18 = scalar_lea.vmem %s1229_s7, %s762_s13 }
  0x30   : > { %827 = vmatpush3.bf16.msra.mxu0 %v973_v1  ;;  %v980_v4 = vld [vmem:[%s1139_s8] sm:$0xff]   ;;  %v981_v15 = vld [vmem:[%s1139_s8 + $0x8] sm:$0xff]   ;;  %v570_v21 = vld [vmem:[%s1227_s5 + $0x10] sm:$0xff] }
  0x31   : > { %828 = vmatprep.subr.bf16.mxu0 %v974_v2  ;;  %840 = vmatprep.mubr.bf16.mxu0 %v980_v4  ;;  %v569_v19 = vld [vmem:[%s1227_s5 + $0x8] sm:$0xff]  ;;  %v571_v22 = vld [vmem:[%s1227_s5 + $0x18] sm:$0xff]  ;;  %v572_v24 = vld [vmem:[%s1227_s5 + $0x20] sm:$0xff] }
  0x32   : > { %847 = vmatpush3.bf16.msra.mxu1 %v983_v6  ;;  %v902_v20 = vpack.c.bf16 %v569_v19, %v568_v18  ;;  %v906_v23 = vpack.c.bf16 %v571_v22, %v570_v21  ;;  %v573_v25 = vld [vmem:[%s1227_s5 + $0x28] sm:$0xff]  ;;  %v574_v27 = vld [vmem:[%s1227_s5 + $0x30] sm:$0xff]  ;;  %v575_v28 = vld [vmem:[%s1227_s5 + $0x38] sm:$0xff] }
  0x33   : > { %848 = vmatprep.subr.bf16.mxu1 %v984_v8  ;;  %v910_v26 = vpack.c.bf16 %v573_v25, %v572_v24  ;;  %v914_v29 = vpack.c.bf16 %v575_v28, %v574_v27  ;;  %v576_v30 = vld [vmem:[%s1227_s5 + $0x40] sm:$0xff]  ;;  %v577_v31 = vld [vmem:[%s1227_s5 + $0x48] sm:$0xff]  ;;  %v578_v50 = vld [vmem:[%s1227_s5 + $0x50] sm:$0xff] }
  0x34   : > { %829 = vmatpush3.bf16.msra.mxu0 %v974_v2  ;;  %v918_v32 = vpack.c.bf16 %v577_v31, %v576_v30  ;;  %v318_v35 = vld [vmem:[%s1224_s2] sm:$0x1]  ;;  %v579_v51 = vld [vmem:[%s1227_s5 + $0x58] sm:$0xff]  ;;  %v581_v54 = vld [vmem:[%s1227_s5 + $0x68] sm:$0xff] }
  0x35   : > { %830 = vmatprep.subr.bf16.mxu0 %v975_v3  ;;  %v431_v36 = vpack.i.b16 %v318_v35, %v318_v35  ;;  %v922_v52 = vpack.c.bf16 %v579_v51, %v578_v50  ;;  %v580_v53 = vld [vmem:[%s1227_s5 + $0x60] sm:$0xff]  ;;  %v582_v56 = vld [vmem:[%s1227_s5 + $0x70] sm:$0xff]  ;;  %v583_v57 = vld [vmem:[%s1227_s5 + $0x78] sm:$0xff] }
  0x36   : > { %849 = vmatpush3.bf16.msra.mxu1 %v984_v8  ;;  %v926_v55 = vpack.c.bf16 %v581_v54, %v580_v53  ;;  %v930_v58 = vpack.c.bf16 %v583_v57, %v582_v56  ;;  %v457_v59 = vld [vmem:[%s1226_s4] sm:$0x1] }
  0x37   : > { %850 = vmatprep.subr.bf16.mxu1 %v985_v10  ;;  %v436_v40 = vrot.slane %v431_v36, %v435_v37  ;;  %v558_v60 = vpack.i.b16 %v457_v59, %v457_v59 }
  0x38   : > { %831 = vmatpush3.bf16.msra.mxu0 %v975_v3 }
  0x39   : > { %832 = vmatprep.subr.bf16.mxu0 %v976_v7  ;;  %v563_v63 = vrot.slane %v558_v60, %v435_v37 }
  0x3a   : > { %851 = vmatpush3.bf16.msra.mxu1 %v985_v10 }
  0x3b   : > { %852 = vmatprep.subr.bf16.mxu1 %v986_v12 }
  0x3c   : > { %833 = vmatpush3.bf16.msra.mxu0 %v976_v7 }
  0x3d   : > { %834 = vmatprep.subr.bf16.mxu0 %v977_v9 }
  0x3e   : > { %853 = vmatpush3.bf16.msra.mxu1 %v986_v12 }
  0x3f   : > { %854 = vmatprep.subr.bf16.mxu1 %v987_v14 }
  0x40   : > { %835 = vmatpush3.bf16.msra.mxu0 %v977_v9 }
  0x41   : > { %836 = vmatprep.subr.bf16.mxu0 %v978_v11 }
  0x42   : > { %855 = vmatpush3.bf16.msra.mxu1 %v987_v14 }
  0x43   : > { %856 = vmatprep.subr.bf16.mxu1 %v988_v16 }
  0x44   : > { %837 = vmatpush3.bf16.msra.mxu0 %v978_v11 }
  0x45   : > { %838 = vmatprep.subr.bf16.mxu0 %v979_v13 }
  0x46   : > { %857 = vmatpush3.bf16.msra.mxu1 %v988_v16 }
  0x47   : > { %858 = vmatprep.subr.bf16.mxu1 %v989_v17 }
  0x48   : > { %839 = vmatpush3.bf16.msra.mxu0 %v979_v13  ;;  %v781_v13 = vld [vmem:[%s1228_s6] ss:$0 sm:$0xff] }
  0x49   : > { %903 = vmatprep.subr.bf16.mxu0 %v902_v20 }
  0x4a   : > { %859 = vmatpush3.bf16.msra.mxu1 %v989_v17 }
  0x4b   : > { %841 = vmatmul.mubr.bf16.vlgmr.msra.gmra.mrb[0].mxu0 %v981_v15  ;;  %934 = vmatprep.subr.bf16.mxu1 %v902_v20 }
  0x4c   : > { %905 = vmatpush3.bf16.msra.mxu0 %v902_v20 }
  0x4d   : > { %907 = vmatprep.subr.bf16.mxu0 %v906_v23 }
  0x50   : > { %909 = vmatpush3.bf16.msra.mxu0 %v906_v23 }
  0x51   : > { %911 = vmatprep.subr.bf16.mxu0 %v910_v26 }
  0x54   : > { %913 = vmatpush3.bf16.msra.mxu0 %v910_v26 }
  0x55   : > { %915 = vmatprep.subr.bf16.mxu0 %v914_v29 }
  0x58   : > { %917 = vmatpush3.bf16.msra.mxu0 %v914_v29 }
  0x59   : > { %919 = vmatprep.subr.bf16.mxu0 %v918_v32 }
  0x5c   : > { %921 = vmatpush3.bf16.msra.mxu0 %v918_v32 }
  0x5d   : > { %923 = vmatprep.subr.bf16.mxu0 %v922_v52 }
  0x60   : > { %925 = vmatpush3.bf16.msra.mxu0 %v922_v52 }
  0x61   : > { %927 = vmatprep.subr.bf16.mxu0 %v926_v55 }
  0x64   : > { %929 = vmatpush3.bf16.msra.mxu0 %v926_v55 }
  0x65   : > { %931 = vmatprep.subr.bf16.mxu0 %v930_v58 }
  0x68   : > { %933 = vmatpush3.bf16.msra.mxu0 %v930_v58 }
 0x11e   : > { %v842_v38 = vpop.f32.mrb[0].mxu0 }
 0x11f   : > { %v413_v39 = vpop.f32.mrb[1].mxu0 }
 0x120   : > { %v843_v41 = vpop.f32.mrb[2].mxu0 }
 0x121   : > { %v429_v42 = vpack.c.bf16 %v843_v41, %v842_v38  ;;  %v416_v43 = vpop.f32.mrb[3].mxu0 }
 0x122   : > { %v428_v44 = vpack.c.bf16 %v416_v43, %v413_v39 }
 0x123   : > { %v438_v45 = vadd.bf16 %v436_v40, %v429_v42 }
 0x124   : > { %v437_v46 = vadd.bf16 %v436_v40, %v428_v44 }
 0x125   : > { %v440_v49 = vmax.bf16 %v1033_v47, %v438_v45 }
 0x126   : > { %v439_v48 = vmax.bf16 %v1033_v47, %v437_v46 }
 0x128   : > { %860 = vmatprep.mubr.bf16.mxu1 %v439_v48 }
 0x129   : > { %861 = vmatmul.mubr.bf16.vlgmr.msra.gmra.mrb[0].mxu1 %v440_v49 }
 0x12a   : > { %942 = vmatpush3.bf16.msra.mxu1 %v902_v20 }
 0x12b   : > { %935 = vmatprep.subr.bf16.mxu1 %v906_v23 }
 0x12e   : > { %943 = vmatpush3.bf16.msra.mxu1 %v906_v23 }
 0x12f   : > { %936 = vmatprep.subr.bf16.mxu1 %v910_v26 }
 0x132   : > { %944 = vmatpush3.bf16.msra.mxu1 %v910_v26 }
 0x133   : > { %937 = vmatprep.subr.bf16.mxu1 %v914_v29 }
 0x136   : > { %945 = vmatpush3.bf16.msra.mxu1 %v914_v29 }
 0x137   : > { %938 = vmatprep.subr.bf16.mxu1 %v918_v32 }
 0x13a   : > { %946 = vmatpush3.bf16.msra.mxu1 %v918_v32 }
 0x13b   : > { %939 = vmatprep.subr.bf16.mxu1 %v922_v52 }
 0x13e   : > { %947 = vmatpush3.bf16.msra.mxu1 %v922_v52 }
 0x13f   : > { %940 = vmatprep.subr.bf16.mxu1 %v926_v55 }
 0x142   : > { %948 = vmatpush3.bf16.msra.mxu1 %v926_v55 }
 0x143   : > { %941 = vmatprep.subr.bf16.mxu1 %v930_v58 }
 0x146   : > { %949 = vmatpush3.bf16.msra.mxu1 %v930_v58 }
 0x1fc   : > { %v862_v61 = vpop.f32.mrb[0].mxu1 }
 0x1fd   : > { %v540_v62 = vpop.f32.mrb[1].mxu1 }
 0x1fe   : > { %v863_v0 = vpop.f32.mrb[2].mxu1 }
 0x1ff   : > { %v556_v1 = vpack.c.bf16 %v863_v0, %v862_v61  ;;  %v543_v2 = vpop.f32.mrb[3].mxu1 }
 0x200   : > { %v555_v3 = vpack.c.bf16 %v543_v2, %v540_v62 }
 0x201   : > { %v565_v4 = vadd.bf16 %v563_v63, %v556_v1 }
 0x202   : > { %v564_v5 = vadd.bf16 %v563_v63, %v555_v3 }
 0x203   : > { %v567_v6 = vmax.bf16 %v1033_v47, %v565_v4 }
 0x204   : > { %v566_v7 = vmax.bf16 %v1033_v47, %v564_v5 }
 0x205   : > { %v588_v8 = vunpack.c.h.bf16 %v567_v6  ;;  %v587_v9 = vunpack.c.l.bf16 %v567_v6 }
 0x206   : > { %v586_v10 = vunpack.c.h.bf16 %v566_v7  ;;  %v585_v11 = vunpack.c.l.bf16 %v566_v7 }
 0x207   : > { %899 = vmatprep.mubr.f32.mxu1 %v587_v9 }
 0x208   : > { %896 = vmatprep.mubr.f32.mxu0 %v585_v11  ;;  %900 = vmatmul.mubr.f32.vlgmr.msra.gmra.mrb[4].mxu1 %v588_v8 }
 0x209   : > { %897 = vmatmul.mubr.f32.vlgmr.msra.gmra.mrb[4].mxu0 %v586_v10 }
 0x2db   : > { %v901_v12 = vpop.f32.mrb[4].mxu1 }
 0x2dc   : > { %v898_v14 = vpop.f32.mrb[4].mxu0  ;;  %v671_v15 = vpop.f32.mrb[5].mxu1  ;;  %v677_v20 = vadd.f32 %v901_v12, %v781_v13 }
 0x2dd   : > { %v661_v16 = vpop.f32.mrb[5].mxu0  ;;  %v667_v18 = vadd.f32 %v898_v14, %v781_v13  ;;  %v672_v19 = vadd.f32 %v781_v13, %v671_v15 }
 0x2de   : > { %v662_v17 = vadd.f32 %v781_v13, %v661_v16  ;;  %683 = vst [vmem:[%s295_s18 + $0x18] sm:$0xff] %v677_v20 }
 0x2df   : > { %681 = vst [vmem:[%s295_s18 + $0x8] sm:$0xff] %v667_v18  ;;  %682 = vst [vmem:[%s295_s18 + $0x10] sm:$0xff] %v672_v19 }
 0x2e0   : > { %680 = vst [vmem:[%s295_s18] sm:$0xff] %v662_v17 }
 0x2e1 PF: > { %s18_s24 = sadd.s32 1, %s1028_s24  }
 0x2e2   : > { %p15_p3 = scmp.ge.s32.totalorder %s18_s24, 4  }
 0x2e4   :  { %17 = sbr.rel (!%p15_p3) target bundleno = 1 (0x1), region = 83 }
 0x2eb   :  { %706 = vsyncpa [#allocation3], 1 }
 0x2ec   :  { %708 = vsyncpa [#allocation3 + $0x1], 1 }

// kernel: linear_mdn_forward.1
= control target key start
LH: loop header
LB: loop body
LE: loop exit
PB: predicated region body
PF: predicated region fallthrough
CT: control target
= control target key end

     0   :  { %12 = vsyncpa [#allocation3], 0  ;;  %s1074_s24 = smov 0   ;;  %s1222_s0 = inlined_call_operand.vmem [shape: bf16[64,128], index: 0, kind: input, shape index: {}]   ;;  %s1223_s1 = inlined_call_operand.vmem [shape: bf16[128,128], index: 1, kind: input, shape index: {}]   ;;  %s1224_s2 = inlined_call_operand.vmem [shape: bf16[1,128], index: 2, kind: input, shape index: {}]   ;;  %s1225_s3 = inlined_call_operand.hbm [shape: bf16[128,128], index: 3, kind: input, shape index: {}]   ;;  %s1226_s4 = inlined_call_operand.vmem [shape: bf16[1,128], index: 4, kind: input, shape index: {}]   ;;  %s1227_s5 = inlined_call_operand.vmem [shape: f32[128,128], index: 5, kind: input, shape index: {}]   ;;  %s1228_s6 = inlined_call_operand.vmem [shape: f32[1,128], index: 6, kind: input, shape index: {}]   ;;  %s1229_s7 = inlined_call_operand.vmem [shape: f32[64,128], index: 7, kind: output, shape index: {}]  }
   0x1 LB: > { %s752_s25 = sadd.s32 4294967295, %s1028_s24   ;;  %p754_p0 = scmp.ge.s32.totalorder %s1028_s24, 1  ;;  %s1028_s24 = sphi %s1074_s24, %s18_s24  }
   0x2   : > { %p201_p1 = scmp.lt.s32.totalorder %s1028_s24, 3  ;;  %s1030_s26 = smov [#allocation2]  }
   0x3   : > { %s219_s27 = sshll.u32 %s1030_s26, 4  ;;  %p1088_p3 = scmp.eq.s32.totalorder %s752_s25, 0  ;;  %s220_s27 = int_to_ptr.vmem [resolvable:$true] %s219_s27 }
   0x4   : > { %p1082_p2 = pnand %p754_p0, %p201_p1  ;;  %s990_s10 = scalar_lea.hbm %s1225_s3, 1024 }
   0x5   : > { %s1234_s29 = scalar_select %p1088_p3, 1, 0 }
   0x6   : > { %s1233_s28 = scalar_select %p1082_p2, 1, 0 }
   0x7   : > { %p954_p4 = pneg %p1082_p2  ;;  %p991_p6 = scmp.ne.s32.totalorder %s1225_s3, %s990_s10 }
   0x8   : > { %p997_p10 = scmp.lt.u32.totalorder %s990_s10, %s1225_s3 }
   0x9   : > { %p1096_p5 = pnand %p1088_p3, %p954_p4 }
   0xb   : > { %p992_p7 = pneg %p1096_p5 }
   0xd   : > { %p993_p8 = pnand %p992_p7, %p991_p6 }
   0xf   : > { %p994_p9 = pneg %p993_p8 }
  0x11   : > { %p999_p11 = pnand %p997_p10, %p994_p9 }
  0x13   : > { %1002 = shalt.err (!%p999_p11)
}
  0x14   : > { %s1003_s15 = scalar_lea.vmem %s220_s27, 1024  ;;  %p1011_p1 = scmp.lt.s32.totalorder %s220_s27, %s220_s27 }
  0x15   : > { %p1004_p12 = scmp.ne.s32.totalorder %s220_s27, %s1003_s15  ;;  %p1012_p4 = scmp.lt.s32.totalorder %s1003_s15, %s1003_s15 }
  0x17   : > { %p1006_p13 = pnand %p1004_p12, %p992_p7  ;;  %p1013_p3 = por %p1012_p4, %p1011_p1 }
  0x19   : > { %p1007_p0 = pneg %p1006_p13 }
  0x1b   : > { %p1014_p2 = pnand %p1013_p3, %p1007_p0 }
  0x1d   : > { %1017 = shalt.err (!%p1014_p2)
}
  0x1e   : > { %s1031_s16 = smov 64   ;;  %s1032_s17 = smov 4  }
  0x1f   : > { %957 = dma.hbm_to_vmem [thread:$0]  (!%p1096_p5), %s1225_s3, 1024, %s220_s27, [#allocation3], %s1031_s16, %s1031_s16, %s1032_s17  }
  0x20   : > { %p1236_p6 = scmp.ne.s32.totalorder %s1233_s28, 0 }
  0x21   : > { %p1237_p8 = scmp.ne.s32.totalorder (!%p1236_p6), %s1234_s29, 0 }
  0x22   : > { %253 = sbr.rel (%p1236_p6) target bundleno = 737 (0x2e1), region = 48 }
  0x29   : > { %1023 = dma.done.wait (%p1237_p8), [#allocation3], 1024  }
  0x2a   : > { %1025 = vsyncadd (%p1237_p8), [#allocation3], 4294966272  ;;  %s759_s20 = sshll.u32 %s752_s25, 2  ;;  %v972_v0 = vld [vmem:[%s1223_s1] sm:$0xff]   ;;  %v973_v1 = vld [vmem:[%s1223_s1 + $0x8] sm:$0xff]   ;;  %v433_v33 = vlaneseq  ;;  %v1033_v47 = vmov 0  }
  0x2b   : > { %p286_p2 = scmp.lt.s32.totalorder %s759_s20, 7  ;;  %824 = vmatprep.subr.bf16.mxu0 %v972_v0  ;;  %v974_v2 = vld [vmem:[%s1223_s1 + $0x10] sm:$0xff]   ;;  %v975_v3 = vld [vmem:[%s1223_s1 + $0x18] sm:$0xff]   ;;  %v982_v5 = vld [vmem:[#allocation2] sm:$0xff]  }
  0x2c   : > { %825 = vmatpush3.bf16.msra.mxu0 %v972_v0  ;;  %v983_v6 = vld [vmem:[#allocation2 + $0x8] sm:$0xff]   ;;  %v976_v7 = vld [vmem:[%s1223_s1 + $0x20] sm:$0xff]   ;;  %844 = vmatprep.subr.bf16.mxu1 %v982_v5  ;;  %v984_v8 = vld [vmem:[#allocation2 + $0x10] sm:$0xff]   ;;  %v434_v34 = vshrl.u32 %v433_v33, 7 }
  0x2d   : > { %s1239_s20 = smov (!%p286_p2, %s759_s20), 7  ;;  %826 = vmatprep.subr.bf16.mxu0 %v973_v1  ;;  %845 = vmatpush3.bf16.msra.mxu1 %v982_v5  ;;  %v977_v9 = vld [vmem:[%s1223_s1 + $0x28] sm:$0xff]   ;;  %v985_v10 = vld [vmem:[#allocation2 + $0x18] sm:$0xff]   ;;  %v978_v11 = vld [vmem:[%s1223_s1 + $0x30] sm:$0xff]  }
  0x2e   : > { %s760_s27 = sshll.u32 %s1239_s20, 2  ;;  %846 = vmatprep.subr.bf16.mxu1 %v983_v6  ;;  %v986_v12 = vld [vmem:[#allocation2 + $0x20] sm:$0xff]   ;;  %v979_v13 = vld [vmem:[%s1223_s1 + $0x38] sm:$0xff]   ;;  %v987_v14 = vld [vmem:[#allocation2 + $0x28] sm:$0xff]   ;;  %v435_v37 = vsub.s32 0, %v434_v34  ;;  %s762_s13 = sshll.u32 %s1239_s20, 3 }
  0x2f   : > { %s1139_s8 = scalar_lea.vmem %s1222_s0, %s760_s27  ;;  %v988_v16 = vld [vmem:[#allocation2 + $0x30] sm:$0xff]   ;;  %v989_v17 = vld [vmem:[#allocation2 + $0x38] sm:$0xff]   ;;  %v568_v18 = vld [vmem:[%s1227_s5] sm:$0xff]  ;;  %s295_s18 = scalar_lea.vmem %s1229_s7, %s762_s13 }
  0x30   : > { %827 = vmatpush3.bf16.msra.mxu0 %v973_v1  ;;  %v980_v4 = vld [vmem:[%s1139_s8] sm:$0xff]   ;;  %v981_v15 = vld [vmem:[%s1139_s8 + $0x8] sm:$0xff]   ;;  %v570_v21 = vld [vmem:[%s1227_s5 + $0x10] sm:$0xff] }
  0x31   : > { %828 = vmatprep.subr.bf16.mxu0 %v974_v2  ;;  %840 = vmatprep.mubr.bf16.mxu0 %v980_v4  ;;  %v569_v19 = vld [vmem:[%s1227_s5 + $0x8] sm:$0xff]  ;;  %v571_v22 = vld [vmem:[%s1227_s5 + $0x18] sm:$0xff]  ;;  %v572_v24 = vld [vmem:[%s1227_s5 + $0x20] sm:$0xff] }
  0x32   : > { %847 = vmatpush3.bf16.msra.mxu1 %v983_v6  ;;  %v902_v20 = vpack.c.bf16 %v569_v19, %v568_v18  ;;  %v906_v23 = vpack.c.bf16 %v571_v22, %v570_v21  ;;  %v573_v25 = vld [vmem:[%s1227_s5 + $0x28] sm:$0xff]  ;;  %v574_v27 = vld [vmem:[%s1227_s5 + $0x30] sm:$0xff]  ;;  %v575_v28 = vld [vmem:[%s1227_s5 + $0x38] sm:$0xff] }
  0x33   : > { %848 = vmatprep.subr.bf16.mxu1 %v984_v8  ;;  %v910_v26 = vpack.c.bf16 %v573_v25, %v572_v24  ;;  %v914_v29 = vpack.c.bf16 %v575_v28, %v574_v27  ;;  %v576_v30 = vld [vmem:[%s1227_s5 + $0x40] sm:$0xff]  ;;  %v577_v31 = vld [vmem:[%s1227_s5 + $0x48] sm:$0xff]  ;;  %v578_v50 = vld [vmem:[%s1227_s5 + $0x50] sm:$0xff] }
  0x34   : > { %829 = vmatpush3.bf16.msra.mxu0 %v974_v2  ;;  %v918_v32 = vpack.c.bf16 %v577_v31, %v576_v30  ;;  %v318_v35 = vld [vmem:[%s1224_s2] sm:$0x1]  ;;  %v579_v51 = vld [vmem:[%s1227_s5 + $0x58] sm:$0xff]  ;;  %v581_v54 = vld [vmem:[%s1227_s5 + $0x68] sm:$0xff] }
  0x35   : > { %830 = vmatprep.subr.bf16.mxu0 %v975_v3  ;;  %v431_v36 = vpack.i.b16 %v318_v35, %v318_v35  ;;  %v922_v52 = vpack.c.bf16 %v579_v51, %v578_v50  ;;  %v580_v53 = vld [vmem:[%s1227_s5 + $0x60] sm:$0xff]  ;;  %v582_v56 = vld [vmem:[%s1227_s5 + $0x70] sm:$0xff]  ;;  %v583_v57 = vld [vmem:[%s1227_s5 + $0x78] sm:$0xff] }
  0x36   : > { %849 = vmatpush3.bf16.msra.mxu1 %v984_v8  ;;  %v926_v55 = vpack.c.bf16 %v581_v54, %v580_v53  ;;  %v930_v58 = vpack.c.bf16 %v583_v57, %v582_v56  ;;  %v457_v59 = vld [vmem:[%s1226_s4] sm:$0x1] }
  0x37   : > { %850 = vmatprep.subr.bf16.mxu1 %v985_v10  ;;  %v436_v40 = vrot.slane %v431_v36, %v435_v37  ;;  %v558_v60 = vpack.i.b16 %v457_v59, %v457_v59 }
  0x38   : > { %831 = vmatpush3.bf16.msra.mxu0 %v975_v3 }
  0x39   : > { %832 = vmatprep.subr.bf16.mxu0 %v976_v7  ;;  %v563_v63 = vrot.slane %v558_v60, %v435_v37 }
  0x3a   : > { %851 = vmatpush3.bf16.msra.mxu1 %v985_v10 }
  0x3b   : > { %852 = vmatprep.subr.bf16.mxu1 %v986_v12 }
  0x3c   : > { %833 = vmatpush3.bf16.msra.mxu0 %v976_v7 }
  0x3d   : > { %834 = vmatprep.subr.bf16.mxu0 %v977_v9 }
  0x3e   : > { %853 = vmatpush3.bf16.msra.mxu1 %v986_v12 }
  0x3f   : > { %854 = vmatprep.subr.bf16.mxu1 %v987_v14 }
  0x40   : > { %835 = vmatpush3.bf16.msra.mxu0 %v977_v9 }
  0x41   : > { %836 = vmatprep.subr.bf16.mxu0 %v978_v11 }
  0x42   : > { %855 = vmatpush3.bf16.msra.mxu1 %v987_v14 }
  0x43   : > { %856 = vmatprep.subr.bf16.mxu1 %v988_v16 }
  0x44   : > { %837 = vmatpush3.bf16.msra.mxu0 %v978_v11 }
  0x45   : > { %838 = vmatprep.subr.bf16.mxu0 %v979_v13 }
  0x46   : > { %857 = vmatpush3.bf16.msra.mxu1 %v988_v16 }
  0x47   : > { %858 = vmatprep.subr.bf16.mxu1 %v989_v17 }
  0x48   : > { %839 = vmatpush3.bf16.msra.mxu0 %v979_v13  ;;  %v781_v13 = vld [vmem:[%s1228_s6] ss:$0 sm:$0xff] }
  0x49   : > { %903 = vmatprep.subr.bf16.mxu0 %v902_v20 }
  0x4a   : > { %859 = vmatpush3.bf16.msra.mxu1 %v989_v17 }
  0x4b   : > { %841 = vmatmul.mubr.bf16.vlgmr.msra.gmra.mrb[0].mxu0 %v981_v15  ;;  %934 = vmatprep.subr.bf16.mxu1 %v902_v20 }
  0x4c   : > { %905 = vmatpush3.bf16.msra.mxu0 %v902_v20 }
  0x4d   : > { %907 = vmatprep.subr.bf16.mxu0 %v906_v23 }
  0x50   : > { %909 = vmatpush3.bf16.msra.mxu0 %v906_v23 }
  0x51   : > { %911 = vmatprep.subr.bf16.mxu0 %v910_v26 }
  0x54   : > { %913 = vmatpush3.bf16.msra.mxu0 %v910_v26 }
  0x55   : > { %915 = vmatprep.subr.bf16.mxu0 %v914_v29 }
  0x58   : > { %917 = vmatpush3.bf16.msra.mxu0 %v914_v29 }
  0x59   : > { %919 = vmatprep.subr.bf16.mxu0 %v918_v32 }
  0x5c   : > { %921 = vmatpush3.bf16.msra.mxu0 %v918_v32 }
  0x5d   : > { %923 = vmatprep.subr.bf16.mxu0 %v922_v52 }
  0x60   : > { %925 = vmatpush3.bf16.msra.mxu0 %v922_v52 }
  0x61   : > { %927 = vmatprep.subr.bf16.mxu0 %v926_v55 }
  0x64   : > { %929 = vmatpush3.bf16.msra.mxu0 %v926_v55 }
  0x65   : > { %931 = vmatprep.subr.bf16.mxu0 %v930_v58 }
  0x68   : > { %933 = vmatpush3.bf16.msra.mxu0 %v930_v58 }
 0x11e   : > { %v842_v38 = vpop.f32.mrb[0].mxu0 }
 0x11f   : > { %v413_v39 = vpop.f32.mrb[1].mxu0 }
 0x120   : > { %v843_v41 = vpop.f32.mrb[2].mxu0 }
 0x121   : > { %v429_v42 = vpack.c.bf16 %v843_v41, %v842_v38  ;;  %v416_v43 = vpop.f32.mrb[3].mxu0 }
 0x122   : > { %v428_v44 = vpack.c.bf16 %v416_v43, %v413_v39 }
 0x123   : > { %v438_v45 = vadd.bf16 %v436_v40, %v429_v42 }
 0x124   : > { %v437_v46 = vadd.bf16 %v436_v40, %v428_v44 }
 0x125   : > { %v440_v49 = vmax.bf16 %v1033_v47, %v438_v45 }
 0x126   : > { %v439_v48 = vmax.bf16 %v1033_v47, %v437_v46 }
 0x128   : > { %860 = vmatprep.mubr.bf16.mxu1 %v439_v48 }
 0x129   : > { %861 = vmatmul.mubr.bf16.vlgmr.msra.gmra.mrb[0].mxu1 %v440_v49 }
 0x12a   : > { %942 = vmatpush3.bf16.msra.mxu1 %v902_v20 }
 0x12b   : > { %935 = vmatprep.subr.bf16.mxu1 %v906_v23 }
 0x12e   : > { %943 = vmatpush3.bf16.msra.mxu1 %v906_v23 }
 0x12f   : > { %936 = vmatprep.subr.bf16.mxu1 %v910_v26 }
 0x132   : > { %944 = vmatpush3.bf16.msra.mxu1 %v910_v26 }
 0x133   : > { %937 = vmatprep.subr.bf16.mxu1 %v914_v29 }
 0x136   : > { %945 = vmatpush3.bf16.msra.mxu1 %v914_v29 }
 0x137   : > { %938 = vmatprep.subr.bf16.mxu1 %v918_v32 }
 0x13a   : > { %946 = vmatpush3.bf16.msra.mxu1 %v918_v32 }
 0x13b   : > { %939 = vmatprep.subr.bf16.mxu1 %v922_v52 }
 0x13e   : > { %947 = vmatpush3.bf16.msra.mxu1 %v922_v52 }
 0x13f   : > { %940 = vmatprep.subr.bf16.mxu1 %v926_v55 }
 0x142   : > { %948 = vmatpush3.bf16.msra.mxu1 %v926_v55 }
 0x143   : > { %941 = vmatprep.subr.bf16.mxu1 %v930_v58 }
 0x146   : > { %949 = vmatpush3.bf16.msra.mxu1 %v930_v58 }
 0x1fc   : > { %v862_v61 = vpop.f32.mrb[0].mxu1 }
 0x1fd   : > { %v540_v62 = vpop.f32.mrb[1].mxu1 }
 0x1fe   : > { %v863_v0 = vpop.f32.mrb[2].mxu1 }
 0x1ff   : > { %v556_v1 = vpack.c.bf16 %v863_v0, %v862_v61  ;;  %v543_v2 = vpop.f32.mrb[3].mxu1 }
 0x200   : > { %v555_v3 = vpack.c.bf16 %v543_v2, %v540_v62 }
 0x201   : > { %v565_v4 = vadd.bf16 %v563_v63, %v556_v1 }
 0x202   : > { %v564_v5 = vadd.bf16 %v563_v63, %v555_v3 }
 0x203   : > { %v567_v6 = vmax.bf16 %v1033_v47, %v565_v4 }
 0x204   : > { %v566_v7 = vmax.bf16 %v1033_v47, %v564_v5 }
 0x205   : > { %v588_v8 = vunpack.c.h.bf16 %v567_v6  ;;  %v587_v9 = vunpack.c.l.bf16 %v567_v6 }
 0x206   : > { %v586_v10 = vunpack.c.h.bf16 %v566_v7  ;;  %v585_v11 = vunpack.c.l.bf16 %v566_v7 }
 0x207   : > { %899 = vmatprep.mubr.f32.mxu1 %v587_v9 }
 0x208   : > { %896 = vmatprep.mubr.f32.mxu0 %v585_v11  ;;  %900 = vmatmul.mubr.f32.vlgmr.msra.gmra.mrb[4].mxu1 %v588_v8 }
 0x209   : > { %897 = vmatmul.mubr.f32.vlgmr.msra.gmra.mrb[4].mxu0 %v586_v10 }
 0x2db   : > { %v901_v12 = vpop.f32.mrb[4].mxu1 }
 0x2dc   : > { %v898_v14 = vpop.f32.mrb[4].mxu0  ;;  %v671_v15 = vpop.f32.mrb[5].mxu1  ;;  %v677_v20 = vadd.f32 %v901_v12, %v781_v13 }
 0x2dd   : > { %v661_v16 = vpop.f32.mrb[5].mxu0  ;;  %v667_v18 = vadd.f32 %v898_v14, %v781_v13  ;;  %v672_v19 = vadd.f32 %v781_v13, %v671_v15 }
 0x2de   : > { %v662_v17 = vadd.f32 %v781_v13, %v661_v16  ;;  %683 = vst [vmem:[%s295_s18 + $0x18] sm:$0xff] %v677_v20 }
 0x2df   : > { %681 = vst [vmem:[%s295_s18 + $0x8] sm:$0xff] %v667_v18  ;;  %682 = vst [vmem:[%s295_s18 + $0x10] sm:$0xff] %v672_v19 }
 0x2e0   : > { %680 = vst [vmem:[%s295_s18] sm:$0xff] %v662_v17 }
 0x2e1 PF: > { %s18_s24 = sadd.s32 1, %s1028_s24  }
 0x2e2   : > { %p15_p3 = scmp.ge.s32.totalorder %s18_s24, 4  }
 0x2e4   :  { %17 = sbr.rel (!%p15_p3) target bundleno = 1 (0x1), region = 83 }
 0x2eb   :  { %706 = vsyncpa [#allocation3], 1 }
 0x2ec   :  { %708 = vsyncpa [#allocation3 + $0x1], 1 }

</bundles_post_ra>
